<compile_context>
chip_gen: v7x
topology: tpu7x:2x2x1
jax: 0.10.0
libtpu: 0.0.40
codegen_flags: <defaults>
</compile_context>

<pallas_src>
import functools
import math

import jax
import jax.numpy as jnp
from jax.experimental import pallas as pl
from jax.experimental.pallas import tpu as pltpu

_VMEM_LIMIT = 64 * 1024 * 1024   # explicit scoped-VMEM limit (default is 16/32 MiB)


def _round_up(x, m):
    return (x + m - 1) // m * m


def _pad2(a, rows, cols):
    r, c = a.shape
    return jnp.pad(a, ((0, rows - r), (0, cols - c)))


def _choose_tiles(n):
    """Return (n_pad, tm, tk) for the aggregation matmul.

    Tiles are kept large (512 x up-to-2048) so y is re-streamed as few times as
    possible and the ~0.35 us/grid-step overhead is amortized.  Even double
    buffered, the footprint is a few MiB -- comfortably inside v7x's 64 MiB
    VMEM and v5e/v6e's 128 MiB.
    """
    if n <= 1024:
        n_pad = _round_up(n, 128)
        return n_pad, n_pad, n_pad
    n_pad = _round_up(n, 512)
    tm = 512
    for tk in (2048, 1024, 512):
        if n_pad % tk == 0:
            return n_pad, tm, tk
    return n_pad, tm, 512   # unreachable (n_pad is a multiple of 512)


# ----------------------------------------------------------------------------
# Kernel 1: fused per-layer feature transform
#   [y | z'] = x_bf16 @ [W_l | W_r]_bf16 ; z = z' + b
# ----------------------------------------------------------------------------
def _xform_kernel(x_ref, w_ref, b_ref, y_ref, z_ref):
    h_pad = y_ref.shape[1]
    x = x_ref[...].astype(jnp.bfloat16)
    yz = jnp.dot(x, w_ref[...], preferred_element_type=jnp.float32)  # (tm, 2*h_pad)
    y_ref[...] = yz[:, :h_pad].astype(y_ref.dtype)               # bf16 MXU operand
    z_ref[...] = (yz[:, h_pad:] + b_ref[...]).astype(z_ref.dtype)  # bf16 epilogue term


def _feature_transform(h, w_lr_bf16, b_f32, *, tm):
    n_pad, f_pad = h.shape
    two_h = w_lr_bf16.shape[1]
    h_pad = two_h // 2
    grid = (n_pad // tm,)
    return pl.pallas_call(
        _xform_kernel,
        out_shape=(
            jax.ShapeDtypeStruct((n_pad, h_pad), jnp.bfloat16),
            jax.ShapeDtypeStruct((n_pad, h_pad), jnp.bfloat16),
        ),
        grid_spec=pltpu.PrefetchScalarGridSpec(
            num_scalar_prefetch=0,
            grid=grid,
            in_specs=[
                pl.BlockSpec((tm, f_pad), lambda i: (i, 0)),
                pl.BlockSpec((f_pad, two_h), lambda i: (0, 0)),
                pl.BlockSpec((1, h_pad), lambda i: (0, 0)),
            ],
            out_specs=(
                pl.BlockSpec((tm, h_pad), lambda i: (i, 0)),
                pl.BlockSpec((tm, h_pad), lambda i: (i, 0)),
            ),
        ),
        compiler_params=pltpu.CompilerParams(
            dimension_semantics=("parallel",),
            vmem_limit_bytes=_VMEM_LIMIT),
    )(h, w_lr_bf16, b_f32)


# ----------------------------------------------------------------------------
# Kernel 2: tiled aggregation matmul
#   acc += mask_bf16 @ y ; epilogue: out = acc * inv_deg + z (+ ReLU)
# ----------------------------------------------------------------------------
def _agg_kernel(adj_ref, y_ref, z_ref, invdeg_ref, o_ref, acc_ref, *, apply_relu):
    k = pl.program_id(1)

    @pl.when(k == 0)
    def _():
        acc_ref[...] = jnp.zeros_like(acc_ref)

    # int8 0/1 mask tile -> bf16 on the VPU (free slack in a mem-bound kernel),
    # bf16 x bf16 on the MXU with fp32 accumulation.
    acc_ref[...] += jnp.dot(adj_ref[...].astype(jnp.bfloat16), y_ref[...],
                            preferred_element_type=jnp.float32)

    @pl.when(k == pl.num_programs(1) - 1)
    def _():
        out = acc_ref[...] * invdeg_ref[...] + z_ref[...].astype(jnp.float32)
        if apply_relu:
            out = jnp.maximum(out, 0.0)
        o_ref[...] = out.astype(o_ref.dtype)


def _aggregate(adj_i8, inv_deg, y_bf16, z_bf16, *, tm, tk, apply_relu, out_dtype):
    n_pad = adj_i8.shape[0]
    h_pad = y_bf16.shape[1]
    grid = (n_pad // tm, n_pad // tk)
    return pl.pallas_call(
        functools.partial(_agg_kernel, apply_relu=apply_relu),
        out_shape=jax.ShapeDtypeStruct((n_pad, h_pad), out_dtype),
        grid_spec=pltpu.PrefetchScalarGridSpec(
            num_scalar_prefetch=0,
            grid=grid,
            in_specs=[
                pl.BlockSpec((tm, tk), lambda i, k: (i, k)),       # int8 mask tile
                pl.BlockSpec((tk, h_pad), lambda i, k: (k, 0)),    # y K-slab (bf16)
                pl.BlockSpec((tm, h_pad), lambda i, k: (i, 0)),    # z epilogue term
                pl.BlockSpec((tm, 1), lambda i, k: (i, 0)),        # per-row 1/deg
            ],
            out_specs=pl.BlockSpec((tm, h_pad), lambda i, k: (i, 0)),
            scratch_shapes=[pltpu.VMEM((tm, h_pad), jnp.float32)],
        ),
        compiler_params=pltpu.CompilerParams(
            dimension_semantics=("parallel", "arbitrary"),
            vmem_limit_bytes=_VMEM_LIMIT),
    )(adj_i8, y_bf16, z_bf16, inv_deg)


# ----------------------------------------------------------------------------
# Glue: sinusoidal positional encoding of counts (plain JAX, tiny)
# ----------------------------------------------------------------------------
def positional_encoding(counts, pe_dim):
    # counts: (N, C) -> (N, C * pe_dim)
    # TODO(synk): verify the frequency convention (-log(10000)/(half-1)) against
    # the reference PositionalEncoding module (not included in the spec).
    assert pe_dim >= 4 and pe_dim % 2 == 0, "pe_dim must be even and >= 4"
    half = pe_dim // 2
    freqs = jnp.exp(jnp.arange(half, dtype=jnp.float32)
                    * -(math.log(10000.0) / (half - 1)))
    emb = counts[..., None] * freqs                               # (N, C, half)
    emb = jnp.concatenate([jnp.sin(emb), jnp.cos(emb)], axis=-1)  # (N, C, pe_dim)
    n, c = counts.shape
    return emb.reshape(n, c * pe_dim)


# ----------------------------------------------------------------------------
# One-time adjacency preparation (hoisted out of the forward; reusable)
# ----------------------------------------------------------------------------
def prepare_adjacency(adj_mask):
    """adj_mask: dense (N, N) 0/1 adjacency (float or bool), no normalization.

    Casts to int8 BEFORE padding (no fp32 N^2 intermediate) and computes the
    fp32 per-row 1/deg used in the aggregation epilogue (mean aggregation).
    """
    n = adj_mask.shape[0]
    n_pad, tm, tk = _choose_tiles(n)
    adj_i8 = _pad2(adj_mask.astype(jnp.int8), n_pad, n_pad)
    deg = jnp.clip(adj_mask.astype(jnp.float32).sum(axis=1, keepdims=True), 1.0, None)
    inv_deg = jnp.pad(1.0 / deg, ((0, n_pad - n), (0, 0)), constant_values=1.0)
    return {"adj": adj_i8, "inv_deg": inv_deg, "n": n,
            "n_pad": n_pad, "tm": tm, "tk": tk}


# ----------------------------------------------------------------------------
# Full SAGE forward
# ----------------------------------------------------------------------------
def sage_forward(params, x, adj_prep, use_counts, counts, pe_dim):
    if use_counts:
        x = jnp.concatenate([x, positional_encoding(counts, pe_dim)], axis=1)

    n, f0 = x.shape
    assert adj_prep["n"] == n
    n_pad, tm, tk = adj_prep["n_pad"], adj_prep["tm"], adj_prep["tk"]

    # Activations stay padded (zero pad rows/cols are inert) until the final slice.
    h = _pad2(x.astype(jnp.float32), n_pad, _round_up(f0, 128))

    n_layers = len(params)
    for i, (w_l, w_r, b) in enumerate(params):
        last = i == n_layers - 1
        f_in, f_out = w_l.shape
        f_pad = _round_up(f_in, 128)
        h_pad = _round_up(f_out, 128)
        assert h.shape == (n_pad, f_pad)

        # Fused weight [W_l | W_r] in bf16 (256-wide MXU output on v6e/v7x).
        wl_p = _pad2(w_l, f_pad, h_pad)
        wr_p = _pad2(w_r, f_pad, h_pad)
        w_lr = jnp.concatenate([wl_p, wr_p], axis=1).astype(jnp.bfloat16)
        b_p = jnp.pad(b, (0, h_pad - f_out)).reshape(1, h_pad).astype(jnp.float32)

        y, z = _feature_transform(h, w_lr, b_p, tm=tm)
        h = _aggregate(adj_prep["adj"], adj_prep["inv_deg"], y, z,
                       tm=tm, tk=tk, apply_relu=not last,
                       out_dtype=jnp.float32 if last else jnp.bfloat16)
        # TODO(synk): F.dropout with training=True is stochastic; eval mode -> identity here.

    out_channels = params[-1][0].shape[1]
    return h[:n, :out_channels]


def init_params(key, dims):
    """dims: list of (fan_in, fan_out) per SAGEConv layer."""
    params = []
    for fan_in, fan_out in dims:
        key, k1, k2 = jax.random.split(key, 3)
        scale = 1.0 / math.sqrt(fan_in)
        w_l = jax.random.uniform(k1, (fan_in, fan_out), jnp.float32, -scale, scale)
        w_r = jax.random.uniform(k2, (fan_in, fan_out), jnp.float32, -scale, scale)
        b = jnp.zeros((fan_out,), jnp.float32)
        params.append((w_l, w_r, b))
    return params


if __name__ == "__main__":
    # Small, deterministic example shapes.
    N = 16               # number of nodes
    in_channels = 8
    count_dim = 3
    pe_dim = 4
    hidden_channels = 32
    out_channels = 16
    num_layers = 3

    key = jax.random.PRNGKey(0)
    k_x, k_adj, k_cnt, k_par = jax.random.split(key, 4)

    x = jax.random.normal(k_x, (N, in_channels), jnp.float32)
    counts = jax.random.uniform(k_cnt, (N, count_dim), jnp.float32, 0.0, 5.0)

    # Dense 0/1 adjacency (no self loops); mean aggregation handled in-kernel
    # via the fp32 per-row 1/deg epilogue scale.
    adj = (jax.random.uniform(k_adj, (N, N), jnp.float32) < 0.3).astype(jnp.float32)
    adj = adj * (1.0 - jnp.eye(N, dtype=jnp.float32))
    adj_prep = prepare_adjacency(adj)   # hoisted: identical across layers/calls

    concat_feature_dim = in_channels + count_dim * pe_dim
    layer_dims = [(concat_feature_dim, hidden_channels)]
    for _ in range(num_layers - 2):
        layer_dims.append((hidden_channels, hidden_channels))
    layer_dims.append((hidden_channels, out_channels))
    params = init_params(k_par, layer_dims)

    out = sage_forward(params, x, adj_prep, True, counts, pe_dim)
    out = jax.block_until_ready(out)
    assert out.shape == (N, out_channels)
    assert jnp.all(jnp.isfinite(out))
    print("KERNEL_OK")
</pallas_src>

<mosaic_0001>
module attributes {stable_mosaic.version = 11 : i64} {
  func.func @_xform_kernel(%arg0: i32, %arg1: memref<128x128xf32, #tpu.memory_space<vmem>>, %arg2: memref<128x256xbf16, #tpu.memory_space<vmem>>, %arg3: memref<1x128xf32, #tpu.memory_space<vmem>>, %arg4: memref<128x128xbf16, #tpu.memory_space<vmem>>, %arg5: memref<128x128xbf16, #tpu.memory_space<vmem>>) attributes {dimension_semantics = [#tpu.dimension_semantics<parallel>], iteration_bounds = array<i64: 1>, scalar_prefetch = 0 : i64, scratch_operands = 0 : i64, tpu.core_type = #tpu.core_type<tc>, window_params = [{transform_indices = @transform_0, window_bounds = array<i64: 128, 128>}, {pipeline_mode = #tpu.pipeline_mode<synchronous>, transform_indices = @transform_1, window_bounds = array<i64: 128, 256>}, {pipeline_mode = #tpu.pipeline_mode<synchronous>, transform_indices = @transform_2, window_bounds = array<i64: 1, 128>}, {transform_indices = @transform_3, window_bounds = array<i64: 128, 128>}, {transform_indices = @transform_4, window_bounds = array<i64: 128, 128>}]} {
    %c0 = arith.constant 0 : index
    %c0_0 = arith.constant 0 : index
    %0 = vector.load %arg1[%c0, %c0_0] : memref<128x128xf32, #tpu.memory_space<vmem>>, vector<128x128xf32>
    %1 = arith.truncf %0 : vector<128x128xf32> to vector<128x128xbf16>
    %c0_1 = arith.constant 0 : index
    %c0_2 = arith.constant 0 : index
    %2 = vector.load %arg2[%c0_1, %c0_2] : memref<128x256xbf16, #tpu.memory_space<vmem>>, vector<128x256xbf16>
    %cst = arith.constant dense<0.000000e+00> : vector<128x256xf32>
    %3 = tpu.matmul %1, %2, %cst {dimension_numbers = #tpu.dot_dimension_numbers<[1], [0], [0], [1], [0, 0, 1, 1], [], []>} : vector<128x128xbf16>, vector<128x256xbf16>, vector<128x256xf32> -> vector<128x256xf32>
    %4 = vector.extract_strided_slice %3 {offsets = [0, 0], sizes = [128, 128], strides = [1, 1]} : vector<128x256xf32> to vector<128x128xf32>
    %5 = arith.truncf %4 : vector<128x128xf32> to vector<128x128xbf16>
    %c0_3 = arith.constant 0 : index
    %c0_4 = arith.constant 0 : index
    %6 = vector.load %arg4[%c0_3, %c0_4] : memref<128x128xbf16, #tpu.memory_space<vmem>>, vector<128x128xbf16>
    tpu.vector_store %arg4[%c0_3, %c0_4], %5 {strides = array<i32>} : memref<128x128xbf16, #tpu.memory_space<vmem>>, vector<128x128xbf16>,
    %7 = vector.extract_strided_slice %3 {offsets = [0, 128], sizes = [128, 128], strides = [1, 1]} : vector<128x256xf32> to vector<128x128xf32>
    %c0_5 = arith.constant 0 : index
    %c0_6 = arith.constant 0 : index
    %8 = vector.load %arg3[%c0_5, %c0_6] : memref<1x128xf32, #tpu.memory_space<vmem>>, vector<1x128xf32>
    %9 = vector.broadcast %8 : vector<1x128xf32> to vector<128x128xf32>
    %10 = arith.addf %7, %9 : vector<128x128xf32>
    %11 = arith.truncf %10 : vector<128x128xf32> to vector<128x128xbf16>
    %c0_7 = arith.constant 0 : index
    %c0_8 = arith.constant 0 : index
    %12 = vector.load %arg5[%c0_7, %c0_8] : memref<128x128xbf16, #tpu.memory_space<vmem>>, vector<128x128xbf16>
    tpu.vector_store %arg5[%c0_7, %c0_8], %11 {strides = array<i32>} : memref<128x128xbf16, #tpu.memory_space<vmem>>, vector<128x128xbf16>,
    return
  }
  func.func @transform_0(%arg0: i32) -> (i32, i32) {
    %c0_i32 = arith.constant 0 : i32
    %c0_i32_0 = arith.constant 0 : i32
    return %arg0, %c0_i32 : i32, i32
  }
  func.func @transform_1(%arg0: i32) -> (i32, i32) {
    %c0_i32 = arith.constant 0 : i32
    %c0_i32_0 = arith.constant 0 : i32
    %c0_i32_1 = arith.constant 0 : i32
    return %c0_i32, %c0_i32_0 : i32, i32
  }
  func.func @transform_2(%arg0: i32) -> (i32, i32) {
    %c0_i32 = arith.constant 0 : i32
    %c0_i32_0 = arith.constant 0 : i32
    %c0_i32_1 = arith.constant 0 : i32
    return %c0_i32, %c0_i32_0 : i32, i32
  }
  func.func @transform_3(%arg0: i32) -> (i32, i32) {
    %c0_i32 = arith.constant 0 : i32
    %c0_i32_0 = arith.constant 0 : i32
    return %arg0, %c0_i32 : i32, i32
  }
  func.func @transform_4(%arg0: i32) -> (i32, i32) {
    %c0_i32 = arith.constant 0 : i32
    %c0_i32_0 = arith.constant 0 : i32
    return %arg0, %c0_i32 : i32, i32
  }
}

</mosaic_0001>

<bundles_post_ra>
// kernel: tpu_custom_call.1
= control target key start
LH: loop header
LB: loop body
LE: loop exit
PB: predicated region body
PF: predicated region fallthrough
CT: control target
= control target key end

     0   :  { %10 = vsyncpa [#allocation3], 0  ;;  %s993_s0 = inlined_call_operand.hbm [shape: f32[128,128], index: 0, kind: input, shape index: {}]   ;;  %s994_s1 = inlined_call_operand.hbm [shape: bf16[128,256], index: 1, kind: input, shape index: {}]   ;;  %s995_s2 = inlined_call_operand.hbm [shape: f32[1,128], index: 2, kind: input, shape index: {}]   ;;  %s996_s3 = inlined_call_operand.hbm [shape: bf16[128,128], index: 3, kind: output, shape index: {0}]   ;;  %s997_s4 = inlined_call_operand.hbm [shape: bf16[128,128], index: 4, kind: output, shape index: {1}]  }
   0x1   :  { %11 = vsyncpa [#allocation6], 0 }
   0x2   :  { %12 = vsyncpa [#allocation4], 0 }
   0x3   :  { %13 = vsyncpa [#allocation10], 0  ;;  %s851_s15 = smov [#allocation5]   ;;  %s852_s17 = smov [#allocation2]  }
   0x4   :  { %s31_s16 = sshll.u32 %s851_s15, 4  ;;  %s19_s18 = sshll.u32 %s852_s17, 4  ;;  %s32_s16 = int_to_ptr.vmem [resolvable:$true] %s31_s16  ;;  %s886_s18 = int_to_ptr.vmem [resolvable:$true] %s19_s18 }
   0x5   :  { %s733_s21 = scalar_lea.hbm %s994_s1, 2048 }
   0x6   :  { %p734_p0 = scmp.ne.s32.totalorder %s994_s1, %s733_s21  ;;  %p737_p1 = scmp.lt.u32.totalorder %s733_s21, %s994_s1 }
   0x8   :  { %p739_p2 = pnand %p737_p1, %p734_p0 }
   0xa   :  { %742 = shalt.err (!%p739_p2)
}
   0xb   :  { %s743_s26 = scalar_lea.vmem %s32_s16, 2048  ;;  %p748_p4 = scmp.lt.s32.totalorder %s32_s16, %s32_s16 }
   0xc   :  { %p744_p3 = scmp.ne.s32.totalorder %s32_s16, %s743_s26  ;;  %p749_p5 = scmp.lt.s32.totalorder %s743_s26, %s743_s26 }
   0xe   :  { %p750_p6 = por %p749_p5, %p748_p4 }
  0x10   :  { %p751_p7 = pnand %p750_p6, %p744_p3 }
  0x12   :  { %754 = shalt.err (!%p751_p7)
}
  0x13   :  { %s853_s27 = smov 128   ;;  %s854_s28 = smov 8  }
  0x14   :  { %37 = dma.hbm_to_vmem [thread:$0]  %s994_s1, 2048, %s32_s16, [#allocation6], %s853_s27, %s853_s27, %s854_s28  }
  0x15   :  { %s755_s7 = scalar_lea.hbm %s993_s0, 2048 }
  0x16   :  { %p756_p8 = scmp.ne.s32.totalorder %s993_s0, %s755_s7  ;;  %p759_p9 = scmp.lt.u32.totalorder %s755_s7, %s993_s0 }
  0x18   :  { %p761_p10 = pnand %p759_p9, %p756_p8 }
  0x1a   :  { %764 = shalt.err (!%p761_p10)
}
  0x1b   :  { %s765_s12 = scalar_lea.vmem %s886_s18, 2048  ;;  %p770_p12 = scmp.lt.s32.totalorder %s886_s18, %s886_s18 }
  0x1c   :  { %p766_p11 = scmp.ne.s32.totalorder %s886_s18, %s765_s12  ;;  %p771_p13 = scmp.lt.s32.totalorder %s765_s12, %s765_s12 }
  0x1e   :  { %p772_p0 = por %p771_p13, %p770_p12 }
  0x20   :  { %p773_p1 = pnand %p772_p0, %p766_p11 }
  0x22   :  { %776 = shalt.err (!%p773_p1)
}
  0x23   :  { %25 = dma.hbm_to_vmem [thread:$0]  %s993_s0, 2048, %s886_s18, [#allocation3], %s853_s27, %s853_s27, %s854_s28  }
  0x24   :  { %s855_s14 = smov [#allocation7]   ;;  %s777_s19 = scalar_lea.hbm %s995_s2, 16 }
  0x25   :  { %s44_s15 = sshll.u32 %s855_s14, 4  ;;  %p778_p2 = scmp.ne.s32.totalorder %s995_s2, %s777_s19  ;;  %s45_s15 = int_to_ptr.vmem [resolvable:$true] %s44_s15 }
  0x26   :  { %p781_p3 = scmp.lt.u32.totalorder %s777_s19, %s995_s2 }
  0x28   :  { %p783_p4 = pnand %p781_p3, %p778_p2 }
  0x2a   :  { %786 = shalt.err (!%p783_p4)
}
  0x2b   :  { %s787_s24 = scalar_lea.vmem %s45_s15, 16  ;;  %s791_s0 = scalar_lea.vmem %s45_s15, 32 }
  0x2c   :  { %p788_p5 = scmp.ne.s32.totalorder %s45_s15, %s787_s24  ;;  %p792_p6 = scmp.lt.s32.totalorder %s45_s15, %s45_s15 }
  0x2d   :  { %p793_p7 = scmp.lt.s32.totalorder %s791_s0, %s787_s24 }
  0x2f   :  { %p794_p8 = por %p793_p7, %p792_p6 }
  0x31   :  { %p795_p9 = pnand %p794_p8, %p788_p5 }
  0x33   :  { %798 = shalt.err (!%p795_p9)
}
  0x34   :  { %47 = dma.hbm_to_vmem [thread:$0]  %s995_s2, 16, %s45_s15, [#allocation6]  }
  0x35   :  { %843 = dma.done.wait [#allocation3], 2048  }
  0x36   :  { %844 = vsyncadd [#allocation3], 4294965248 }
  0x37   :  { %845 = dma.done.wait [#allocation6], 2064  }
  0x38   :  { %846 = vsyncadd [#allocation6], 4294965232  ;;  %v856_v0 = vmov 0   ;;  %v709_v1 = vld [vmem:[#allocation5 + $0x4] ss:$8 sps:$4 sm:$0xff]   ;;  %v60_v23 = vld [vmem:[#allocation2 + $0x10] sm:$0xff] }
  0x39   :  { %210 = vmatprep.mubr.bf16.mxu0 %v856_v0  ;;  %250 = vmatprep.mubr.bf16.mxu1 %v856_v0  ;;  %v711_v2 = vld [vmem:[#allocation5] ss:$8 sps:$4 sm:$0xff]   ;;  %v712_v3 = vld [vmem:[#allocation5 + $0x14] ss:$8 sps:$4 sm:$0xff]   ;;  %v714_v4 = vld [vmem:[#allocation5 + $0x10] ss:$8 sps:$4 sm:$0xff]  }
  0x3a   :  { %178 = vmatprep.subr.bf16.mxu0 %v709_v1  ;;  %683 = vmatprep.subr.bf16.mxu1 %v709_v1  ;;  %v715_v5 = vld [vmem:[#allocation5 + $0x24] ss:$8 sps:$4 sm:$0xff]   ;;  %v717_v6 = vld [vmem:[#allocation5 + $0x20] ss:$8 sps:$4 sm:$0xff]   ;;  %v718_v7 = vld [vmem:[#allocation5 + $0x34] ss:$8 sps:$4 sm:$0xff]  }
  0x3b   :  { %179 = vmatpush1.bf16.msra.mxu0 %v711_v2  ;;  %691 = vmatpush1.bf16.msra.mxu1 %v711_v2  ;;  %v720_v8 = vld [vmem:[#allocation5 + $0x30] ss:$8 sps:$4 sm:$0xff]   ;;  %v721_v9 = vld [vmem:[#allocation5 + $0x44] ss:$8 sps:$4 sm:$0xff]   ;;  %v723_v10 = vld [vmem:[#allocation5 + $0x40] ss:$8 sps:$4 sm:$0xff]  }
  0x3c   :  { %180 = vmatprep.subr.bf16.mxu0 %v712_v3  ;;  %684 = vmatprep.subr.bf16.mxu1 %v712_v3  ;;  %v724_v11 = vld [vmem:[#allocation5 + $0x54] ss:$8 sps:$4 sm:$0xff]   ;;  %v726_v12 = vld [vmem:[#allocation5 + $0x50] ss:$8 sps:$4 sm:$0xff]   ;;  %v727_v13 = vld [vmem:[#allocation5 + $0x64] ss:$8 sps:$4 sm:$0xff]  }
  0x3d   :  { %v729_v14 = vld [vmem:[#allocation5 + $0x60] ss:$8 sps:$4 sm:$0xff]   ;;  %v730_v15 = vld [vmem:[#allocation5 + $0x74] ss:$8 sps:$4 sm:$0xff]   ;;  %v732_v16 = vld [vmem:[#allocation5 + $0x70] ss:$8 sps:$4 sm:$0xff]  }
  0x3e   :  { %v58_v17 = vld [vmem:[#allocation2] sm:$0xff]  ;;  %v59_v18 = vld [vmem:[#allocation2 + $0x8] sm:$0xff]  ;;  %v61_v24 = vld [vmem:[#allocation2 + $0x18] sm:$0xff]  ;;  %s857_s2 = smov [#allocation8]   ;;  %s858_s27 = smov [#allocation9]  }
  0x3f   :  { %181 = vmatpush1.bf16.msra.mxu0 %v714_v4  ;;  %692 = vmatpush1.bf16.msra.mxu1 %v714_v4  ;;  %v66_v19 = vld [vmem:[#allocation2 + $0x40] sm:$0xff]  ;;  %v67_v20 = vld [vmem:[#allocation2 + $0x48] sm:$0xff]  ;;  %v74_v21 = vpack.c.bf16 %v59_v18, %v58_v17  ;;  %v68_v25 = vld [vmem:[#allocation2 + $0x50] sm:$0xff]  ;;  %v75_v27 = vpack.c.bf16 %v61_v24, %v60_v23  ;;  %s479_s26 = sshll.u32 %s857_s2, 4  ;;  %s491_s28 = sshll.u32 %s858_s27, 4  ;;  %s951_s26 = int_to_ptr.vmem [resolvable:$true] %s479_s26  ;;  %s957_s28 = int_to_ptr.vmem [resolvable:$true] %s491_s28 }
  0x40   :  { %182 = vmatprep.subr.bf16.mxu0 %v715_v5  ;;  %685 = vmatprep.subr.bf16.mxu1 %v715_v5  ;;  %v78_v22 = vpack.c.bf16 %v67_v20, %v66_v19  ;;  %v69_v26 = vld [vmem:[#allocation2 + $0x58] sm:$0xff]  ;;  %v62_v29 = vld [vmem:[#allocation2 + $0x20] sm:$0xff]  ;;  %v63_v30 = vld [vmem:[#allocation2 + $0x28] sm:$0xff]  ;;  %s799_s29 = scalar_lea.vmem %s951_s26, 1024  ;;  %p804_p11 = scmp.lt.s32.totalorder %s951_s26, %s951_s26 }
  0x41   :  { %v79_v28 = vpack.c.bf16 %v69_v26, %v68_v25  ;;  %v70_v31 = vld [vmem:[#allocation2 + $0x60] sm:$0xff]  ;;  %v71_v32 = vld [vmem:[#allocation2 + $0x68] sm:$0xff]  ;;  %v76_v33 = vpack.c.bf16 %v63_v30, %v62_v29  ;;  %v64_v35 = vld [vmem:[#allocation2 + $0x30] sm:$0xff]  ;;  %p800_p10 = scmp.ne.s32.totalorder %s951_s26, %s799_s29  ;;  %p805_p12 = scmp.lt.s32.totalorder %s799_s29, %s799_s29 }
  0x42   :  { %v80_v34 = vpack.c.bf16 %v71_v32, %v70_v31  ;;  %v65_v36 = vld [vmem:[#allocation2 + $0x38] sm:$0xff]  ;;  %v72_v37 = vld [vmem:[#allocation2 + $0x70] sm:$0xff]  ;;  %v937_v44 = vld [vmem:[#allocation7] ss:$0 sm:$0xff] }
  0x43   :  { %183 = vmatpush1.bf16.msra.mxu0 %v717_v6  ;;  %693 = vmatpush1.bf16.msra.mxu1 %v717_v6  ;;  %v73_v38 = vld [vmem:[#allocation2 + $0x78] sm:$0xff]  ;;  %v77_v39 = vpack.c.bf16 %v65_v36, %v64_v35  ;;  %p806_p13 = por %p805_p12, %p804_p11 }
  0x44   :  { %184 = vmatprep.subr.bf16.mxu0 %v718_v7  ;;  %686 = vmatprep.subr.bf16.mxu1 %v718_v7  ;;  %v81_v40 = vpack.c.bf16 %v73_v38, %v72_v37 }
  0x45   :  { %p807_p0 = pnand %p806_p13, %p800_p10 }
  0x47   :  { %185 = vmatpush1.bf16.msra.mxu0 %v720_v8  ;;  %694 = vmatpush1.bf16.msra.mxu1 %v720_v8 }
  0x48   :  { %186 = vmatprep.subr.bf16.mxu0 %v721_v9  ;;  %687 = vmatprep.subr.bf16.mxu1 %v721_v9 }
  0x4b   :  { %187 = vmatpush1.bf16.msra.mxu0 %v723_v10  ;;  %695 = vmatpush1.bf16.msra.mxu1 %v723_v10 }
  0x4c   :  { %188 = vmatprep.subr.bf16.mxu0 %v724_v11  ;;  %688 = vmatprep.subr.bf16.mxu1 %v724_v11 }
  0x4f   :  { %189 = vmatpush1.bf16.msra.mxu0 %v726_v12  ;;  %696 = vmatpush1.bf16.msra.mxu1 %v726_v12 }
  0x50   :  { %190 = vmatprep.subr.bf16.mxu0 %v727_v13  ;;  %689 = vmatprep.subr.bf16.mxu1 %v727_v13 }
  0x53   :  { %191 = vmatpush1.bf16.msra.mxu0 %v729_v14  ;;  %697 = vmatpush1.bf16.msra.mxu1 %v729_v14 }
  0x54   :  { %192 = vmatprep.subr.bf16.mxu0 %v730_v15  ;;  %690 = vmatprep.subr.bf16.mxu1 %v730_v15 }
  0x57   :  { %193 = vmatpush1.bf16.msra.mxu0 %v732_v16  ;;  %698 = vmatpush1.bf16.msra.mxu1 %v732_v16 }
  0x5a   :  { %211 = vmatmul.mubr.bf16.vlgmr.msra.gmra.mrb[0].mxu0 %v74_v21  ;;  %251 = vmatmul.mubr.bf16.vlgmr.msra.gmra.mrb[0].mxu1 %v78_v22 }
  0x5b   :  { %220 = vmatprep.mubr.bf16.mxu0 %v856_v0  ;;  %260 = vmatprep.mubr.bf16.mxu1 %v856_v0 }
  0x62   :  { %221 = vmatmul.mubr.bf16.gmra.mrb[4].mxu0 %v75_v27  ;;  %261 = vmatmul.mubr.bf16.gmra.mrb[4].mxu1 %v79_v28 }
  0x63   :  { %230 = vmatprep.mubr.bf16.mxu0 %v856_v0  ;;  %270 = vmatprep.mubr.bf16.mxu1 %v856_v0 }
  0x6a   :  { %231 = vmatmul.mubr.bf16.gmra.mrb[8].mxu0 %v76_v33  ;;  %271 = vmatmul.mubr.bf16.gmra.mrb[8].mxu1 %v80_v34 }
  0x6b   :  { %240 = vmatprep.mubr.bf16.mxu0 %v856_v0  ;;  %280 = vmatprep.mubr.bf16.mxu1 %v856_v0 }
  0x72   :  { %241 = vmatmul.mubr.bf16.gmra.mrb[12].mxu0 %v77_v39  ;;  %281 = vmatmul.mubr.bf16.gmra.mrb[12].mxu1 %v81_v40 }
 0x12d   :  { %v212_v41 = vpop.f32.mrb[0].mxu0  ;;  %v252_v42 = vpop.f32.mrb[0].mxu1 }
 0x12e   :  { %v214_v43 = vpop.f32.mrb[1].mxu0  ;;  %v254_v45 = vpop.f32.mrb[1].mxu1 }
 0x12f   :  { %v216_v46 = vpop.f32.mrb[2].mxu0  ;;  %v256_v47 = vpop.f32.mrb[2].mxu1  ;;  %v378_v52 = vadd.f32 %v937_v44, %v214_v43  ;;  %v386_v53 = vadd.f32 %v937_v44, %v254_v45 }
 0x130   :  { %v592_v48 = vpack.c.bf16 %v216_v46, %v212_v41  ;;  %v612_v49 = vpack.c.bf16 %v256_v47, %v252_v42  ;;  %v218_v50 = vpop.f32.mrb[3].mxu0  ;;  %v258_v51 = vpop.f32.mrb[3].mxu1 }
 0x131   :  { %v379_v54 = vadd.f32 %v937_v44, %v218_v50  ;;  %v387_v55 = vadd.f32 %v937_v44, %v258_v51 }
 0x132   :  { %593 = vst [vmem:[#allocation8] sm:$0xff] %v592_v48   ;;  %672 = vst [vmem:[#allocation8 + $0x20] sm:$0xff] %v612_v49  }
 0x133   :  { %v632_v56 = vpack.c.bf16 %v379_v54, %v378_v52  ;;  %v652_v57 = vpack.c.bf16 %v387_v55, %v386_v53 }
 0x135   :  { %633 = vst [vmem:[#allocation9] sm:$0xff] %v632_v56   ;;  %679 = vst [vmem:[#allocation9 + $0x20] sm:$0xff] %v652_v57   ;;  %v222_v58 = vpop.f32.mrb[4].mxu0  ;;  %v262_v59 = vpop.f32.mrb[4].mxu1 }
 0x136   :  { %v224_v60 = vpop.f32.mrb[5].mxu0  ;;  %v264_v61 = vpop.f32.mrb[5].mxu1 }
 0x137   :  { %v226_v62 = vpop.f32.mrb[6].mxu0  ;;  %v266_v63 = vpop.f32.mrb[6].mxu1  ;;  %v380_v4 = vadd.f32 %v937_v44, %v224_v60  ;;  %v388_v5 = vadd.f32 %v937_v44, %v264_v61 }
 0x138   :  { %v597_v0 = vpack.c.bf16 %v226_v62, %v222_v58  ;;  %v617_v1 = vpack.c.bf16 %v266_v63, %v262_v59  ;;  %v228_v2 = vpop.f32.mrb[7].mxu0  ;;  %v268_v3 = vpop.f32.mrb[7].mxu1 }
 0x139   :  { %v381_v6 = vadd.f32 %v937_v44, %v228_v2  ;;  %v389_v7 = vadd.f32 %v937_v44, %v268_v3 }
 0x13a   :  { %669 = vst [vmem:[#allocation8 + $0x8] sm:$0xff] %v597_v0   ;;  %673 = vst [vmem:[#allocation8 + $0x28] sm:$0xff] %v617_v1  }
 0x13b   :  { %v637_v8 = vpack.c.bf16 %v381_v6, %v380_v4  ;;  %v657_v9 = vpack.c.bf16 %v389_v7, %v388_v5 }
 0x13d   :  { %676 = vst [vmem:[#allocation9 + $0x8] sm:$0xff] %v637_v8   ;;  %680 = vst [vmem:[#allocation9 + $0x28] sm:$0xff] %v657_v9   ;;  %v232_v10 = vpop.f32.mrb[8].mxu0  ;;  %v272_v11 = vpop.f32.mrb[8].mxu1 }
 0x13e   :  { %v234_v12 = vpop.f32.mrb[9].mxu0  ;;  %v274_v13 = vpop.f32.mrb[9].mxu1 }
 0x13f   :  { %v236_v14 = vpop.f32.mrb[10].mxu0  ;;  %v276_v15 = vpop.f32.mrb[10].mxu1  ;;  %v382_v20 = vadd.f32 %v937_v44, %v234_v12  ;;  %v390_v21 = vadd.f32 %v937_v44, %v274_v13 }
 0x140   :  { %v602_v16 = vpack.c.bf16 %v236_v14, %v232_v10  ;;  %v622_v17 = vpack.c.bf16 %v276_v15, %v272_v11  ;;  %v238_v18 = vpop.f32.mrb[11].mxu0  ;;  %v278_v19 = vpop.f32.mrb[11].mxu1 }
 0x141   :  { %v383_v22 = vadd.f32 %v937_v44, %v238_v18  ;;  %v391_v23 = vadd.f32 %v937_v44, %v278_v19 }
 0x142   :  { %670 = vst [vmem:[#allocation8 + $0x10] sm:$0xff] %v602_v16   ;;  %674 = vst [vmem:[#allocation8 + $0x30] sm:$0xff] %v622_v17  }
 0x143   :  { %v642_v24 = vpack.c.bf16 %v383_v22, %v382_v20  ;;  %v662_v25 = vpack.c.bf16 %v391_v23, %v390_v21 }
 0x145   :  { %677 = vst [vmem:[#allocation9 + $0x10] sm:$0xff] %v642_v24   ;;  %681 = vst [vmem:[#allocation9 + $0x30] sm:$0xff] %v662_v25   ;;  %v242_v26 = vpop.f32.mrb[12].mxu0  ;;  %v282_v27 = vpop.f32.mrb[12].mxu1 }
 0x146   :  { %v244_v28 = vpop.f32.mrb[13].mxu0  ;;  %v284_v29 = vpop.f32.mrb[13].mxu1 }
 0x147   :  { %v246_v30 = vpop.f32.mrb[14].mxu0  ;;  %v286_v31 = vpop.f32.mrb[14].mxu1  ;;  %v384_v36 = vadd.f32 %v937_v44, %v244_v28  ;;  %v392_v37 = vadd.f32 %v937_v44, %v284_v29 }
 0x148   :  { %v607_v32 = vpack.c.bf16 %v246_v30, %v242_v26  ;;  %v627_v33 = vpack.c.bf16 %v286_v31, %v282_v27  ;;  %v248_v34 = vpop.f32.mrb[15].mxu0  ;;  %v288_v35 = vpop.f32.mrb[15].mxu1 }
 0x149   :  { %v385_v38 = vadd.f32 %v937_v44, %v248_v34  ;;  %v393_v39 = vadd.f32 %v937_v44, %v288_v35 }
 0x14a   :  { %671 = vst [vmem:[#allocation8 + $0x18] sm:$0xff] %v607_v32   ;;  %675 = vst [vmem:[#allocation8 + $0x38] sm:$0xff] %v627_v33  }
 0x14b   :  { %v647_v40 = vpack.c.bf16 %v385_v38, %v384_v36  ;;  %v667_v41 = vpack.c.bf16 %v393_v39, %v392_v37 }
 0x14c   :  { %810 = shalt.err (!%p807_p0)
}
 0x14d   :  { %s811_s6 = scalar_lea.hbm %s996_s3, 1024 }
 0x14e   :  { %p812_p1 = scmp.ne.s32.totalorder %s996_s3, %s811_s6  ;;  %p815_p2 = scmp.lt.u32.totalorder %s811_s6, %s996_s3 }
 0x150   :  { %p817_p3 = pnand %p815_p2, %p812_p1 }
 0x152   :  { %820 = shalt.err (!%p817_p3)
}
 0x153   :  { %s859_s11 = smov 64   ;;  %s860_s12 = smov 4   ;;  %678 = vst [vmem:[#allocation9 + $0x18] sm:$0xff] %v647_v40   ;;  %682 = vst [vmem:[#allocation9 + $0x38] sm:$0xff] %v667_v41  }
 0x154   :  { %485 = dma.vmem_to_hbm [thread:$0]  %s951_s26, 1024, %s996_s3, [#allocation4], %s859_s11, %s859_s11, %s860_s12  }
 0x155   :  { %s821_s14 = scalar_lea.vmem %s957_s28, 1024  ;;  %p826_p5 = scmp.lt.s32.totalorder %s957_s28, %s957_s28 }
 0x156   :  { %p822_p4 = scmp.ne.s32.totalorder %s957_s28, %s821_s14  ;;  %p827_p6 = scmp.lt.s32.totalorder %s821_s14, %s821_s14 }
 0x158   :  { %p828_p7 = por %p827_p6, %p826_p5 }
 0x15a   :  { %p829_p8 = pnand %p828_p7, %p822_p4 }
 0x15c   :  { %832 = shalt.err (!%p829_p8)
}
 0x15d   :  { %s833_s17 = scalar_lea.hbm %s997_s4, 1024 }
 0x15e   :  { %p834_p9 = scmp.ne.s32.totalorder %s997_s4, %s833_s17  ;;  %p837_p10 = scmp.lt.u32.totalorder %s833_s17, %s997_s4 }
 0x160   :  { %p839_p11 = pnand %p837_p10, %p834_p9 }
 0x162   :  { %842 = shalt.err (!%p839_p11)
}
 0x163   :  { %497 = dma.vmem_to_hbm [thread:$0]  %s957_s28, 1024, %s997_s4, [#allocation10], %s859_s11, %s859_s11, %s860_s12  }
 0x164   :  { %847 = dma.done.wait [#allocation4], 1024  }
 0x165   :  { %848 = vsyncadd [#allocation4], 4294966272 }
 0x166   :  { %849 = dma.done.wait [#allocation10], 1024  }
 0x167   :  { %850 = vsyncadd [#allocation10], 4294966272 }
 0x168   :  { %504 = vsyncpa [#allocation3], 1 }
 0x169   :  { %505 = vsyncpa [#allocation6], 1 }
 0x16a   :  { %506 = vsyncpa [#allocation4], 1 }
 0x16b   :  { %507 = vsyncpa [#allocation10], 1 }

</bundles_post_ra>
